<compile_context>
chip_gen: v6e
topology: v6e:2x2x1
jax: 0.10.0
libtpu: 0.0.40
codegen_flags: <defaults>
</compile_context>

<pallas_src>
import jax
import jax.numpy as jnp
import numpy as np
from jax.experimental import pallas as pl
from jax.experimental.pallas import tpu as pltpu


def _round_up(x, m):
    return ((x + m - 1) // m) * m


# ----------------------------------------------------------------------------
# Pallas kernel: MILQT combine / classify / mask hot path (one batch tile)
# ----------------------------------------------------------------------------
def milqt_kernel(
    feats_ref,             # (M, TB, H)   bf16 VMEM  (batch-tiled)
    qemb_ref,              # (TB, H)      f32  VMEM  (batch-tiled)
    wcflat_ref,            # (H, M*AP)    bf16 VMEM  resident classifier weights
    bc_ref,                # (M, 1, AP)   f32  VMEM  resident classifier biases
    wcomb_ref,             # (M,)         f32  SMEM  pred_combining_layer weights
    wq_ref,                # (H, QP)      f32  VMEM  qt classifier weight (Q padded)
    bq_ref,                # (1, QP)      f32  VMEM  qt classifier bias (pad = -1e30)
    qmap_ref,              # (QP, AP)     bf16 VMEM  question_type_mapping
    # outputs
    preds_comb_ref,        # (M, TB, AP)  f32
    model_preds_ref,       # (TB, AP)     f32
    model_preds_comb_ref,  # (TB, AP)     f32
    qt_preds_ref,          # (TB, QP)     f32
    mask_ref,              # (TB, AP)     f32
):
    M = feats_ref.shape[0]
    TB = qemb_ref.shape[0]
    QP = qt_preds_ref.shape[1]
    AP = mask_ref.shape[1]

    qemb = qemb_ref[...]                        # f32, feeds the qt classify
    qemb_bf = qemb.astype(jnp.bfloat16)         # one cast per tile for MXU feeds

    # question_type_preds = qt_model.classify(question_emb) -- kept on an f32
    # path so the first-max argmax below tracks an f32 reference.
    qt = jnp.dot(qemb, wq_ref[...], preferred_element_type=jnp.float32) + bq_ref[...]
    qt_preds_ref[...] = qt

    # Shared wide dot: qemb @ [w_0 | w_1 | ... | w_{M-1}] -> (TB, M*AP).
    # combination_operator == 'add'  =>  pred_combined_m = pred_m + qemb @ w_m,
    # so the per-model feature add + second classify collapse into slices of
    # this single wide-N MXU dot.
    qw_all = jnp.dot(qemb_bf, wcflat_ref[...], preferred_element_type=jnp.float32)

    mp = jnp.zeros((TB, AP), jnp.float32)
    mpc = jnp.zeros((TB, AP), jnp.float32)

    # static loop over the (small, static) number of sub-models
    # TODO(synk): switch to lax.fori_loop(unroll=True) or a grid axis if M grows large.
    for m in range(M):
        f = feats_ref[m]                                  # (TB, H)  bf16
        w = wcflat_ref[:, m * AP:(m + 1) * AP]            # (H, AP)  bf16, lane-aligned slab
        b = bc_ref[m]                                     # (1, AP)  f32

        pred = jnp.dot(f, w, preferred_element_type=jnp.float32) + b   # classify(features[m])
        pred_c = pred + qw_all[:, m * AP:(m + 1) * AP]                 # classify(features[m]+qemb)

        preds_comb_ref[m] = pred_c

        # pred_combining_layer: Linear(M, 1, bias=False) over the model axis
        wm = wcomb_ref[m]                                 # scalar from SMEM
        mp = mp + wm * pred
        mpc = mpc + wm * pred_c

    model_preds_ref[...] = mp
    model_preds_comb_ref[...] = mpc

    # question_types = question_type_preds.max(1).indices  (first max, as torch)
    # Pad columns carry a -1e30 bias so they can never win.
    col = jax.lax.broadcasted_iota(jnp.int32, (TB, QP), 1)       # built once, reused
    maxv = jnp.max(qt, axis=1, keepdims=True)
    arg = jnp.min(jnp.where(qt == maxv, col, QP), axis=1, keepdims=True)

    # mask[i] = question_type_mapping[question_types[i]] -> one-hot @ mapping.
    # 0/1 values are exact in bf16, so the bf16 MXU path is bit-exact here.
    onehot = (col == arg).astype(jnp.bfloat16)
    mask_ref[...] = jnp.dot(onehot, qmap_ref[...],
                            preferred_element_type=jnp.float32)


# ----------------------------------------------------------------------------
# Wrapper: pad / cast once, tile over batch, call the kernel, slice back
# ----------------------------------------------------------------------------
def milqt_pallas(feats, qemb, wc, bc, wcomb, wq, bq, qmap, *, tb=None):
    M, B, H = feats.shape
    A = wc.shape[2]
    Q = wq.shape[1]
    QP = _round_up(max(Q, 128), 128)          # lane-dense question-type dim
    AP = _round_up(A, 128)                    # lane-dense answer dim

    # Batch tile: multiple of 8 sublanes; ensure >=2 grid steps when the batch
    # allows it so both v7x TensorCores get work under "parallel" semantics.
    # TODO(synk): on v6e (128 MiB VMEM) a larger tb (512-1024) is better at large B.
    if tb is None:
        tb = 256
    tb = max(8, _round_up(min(tb, B), 8))
    if B > 8 and _round_up(B, tb) // tb < 2:
        tb = _round_up((B + 1) // 2, 8)
    Bp = _round_up(B, tb)
    grid = (Bp // tb,)

    f32, bf16 = jnp.float32, jnp.bfloat16

    # feats (M,B,H) is the dominant HBM read stream -> bf16 halves DMA + VMEM.
    feats_p = jnp.pad(feats.astype(bf16), ((0, 0), (0, Bp - B), (0, 0)))
    qemb_p = jnp.pad(qemb.astype(f32), ((0, Bp - B), (0, 0)))

    # classifier weights: (M,H,A) -> lane-aligned bf16 slab (H, M*AP), cast ONCE here
    wc_pad = jnp.zeros((M, H, AP), f32).at[:, :, :A].set(wc.astype(f32))
    wcflat = jnp.transpose(wc_pad, (1, 0, 2)).reshape(H, M * AP).astype(bf16)
    bc_pad = jnp.zeros((M, 1, AP), f32).at[:, :, :A].set(bc.astype(f32))

    # lane-dense question-type classifier / mapping (pad bias -1e30 never wins argmax)
    wq_p = jnp.zeros((H, QP), f32).at[:, :Q].set(wq.astype(f32))
    bq_p = jnp.full((1, QP), -1e30, f32).at[:, :Q].set(bq.astype(f32))
    # the mapping is a 0/1 answer mask -> exactly representable in bf16
    qmap_p = jnp.zeros((QP, AP), bf16).at[:Q, :A].set(qmap.astype(bf16))

    resident2 = lambda bs: pl.BlockSpec(bs, lambda i: (0, 0))
    smem = pl.BlockSpec(memory_space=pltpu.MemorySpace.SMEM)

    # TODO(synk): on v5e, if profiling shows the feats DMA exposed, add
    # pipeline_mode=pl.Buffered(3) to the feats BlockSpec.
    in_specs = [
        pl.BlockSpec((M, tb, H), lambda i: (0, i, 0)),   # feats, tiled on B (bf16)
        pl.BlockSpec((tb, H), lambda i: (i, 0)),         # qemb,  tiled on B (f32)
        resident2((H, M * AP)),                          # wcflat (VMEM-resident bf16)
        pl.BlockSpec((M, 1, AP), lambda i: (0, 0, 0)),   # bc
        smem,                                            # wcomb (scalars)
        resident2((H, QP)),                              # wq
        resident2((1, QP)),                              # bq
        resident2((QP, AP)),                             # qmap (bf16)
    ]
    out_specs = (
        pl.BlockSpec((M, tb, AP), lambda i: (0, i, 0)),  # preds_combined (stacked)
        pl.BlockSpec((tb, AP), lambda i: (i, 0)),        # model_preds
        pl.BlockSpec((tb, AP), lambda i: (i, 0)),        # model_preds_combined
        pl.BlockSpec((tb, QP), lambda i: (i, 0)),        # question_type_preds (padded)
        pl.BlockSpec((tb, AP), lambda i: (i, 0)),        # mask
    )
    # TODO(synk): emit preds_combined in bf16 if downstream consumers tolerate it
    # (it is the largest HBM writeback).
    out_shape = (
        jax.ShapeDtypeStruct((M, Bp, AP), f32),
        jax.ShapeDtypeStruct((Bp, AP), f32),
        jax.ShapeDtypeStruct((Bp, AP), f32),
        jax.ShapeDtypeStruct((Bp, QP), f32),
        jax.ShapeDtypeStruct((Bp, AP), f32),
    )

    flops = (2 * M * Bp * H * AP          # per-model feature classify
             + 2 * Bp * H * (M * AP)      # shared qemb @ all-model weights
             + 2 * Bp * H * QP            # question-type classify
             + 2 * Bp * QP * AP)          # one-hot @ mapping
    bytes_accessed = (2 * feats_p.size + 4 * qemb_p.size + 2 * wcflat.size
                      + 4 * bc_pad.size + 4 * M + 4 * wq_p.size + 4 * bq_p.size
                      + 2 * qmap_p.size
                      + 4 * ((M + 3) * Bp * AP + Bp * QP))

    preds_c, mp, mpc, qt, mask = pl.pallas_call(
        milqt_kernel,
        out_shape=out_shape,
        grid=grid,
        in_specs=in_specs,
        out_specs=out_specs,
        compiler_params=pltpu.CompilerParams(
            dimension_semantics=("parallel",),     # megacore sharding on v7x
            # above the 16 MiB (v5e) / 32 MiB (v6e/v7x) scoped defaults,
            # below v7x's 64 MiB physical VMEM
            vmem_limit_bytes=48 * 1024 * 1024,
        ),
        cost_estimate=pl.CostEstimate(flops=flops, transcendentals=0,
                                      bytes_accessed=bytes_accessed),
    )(feats_p, qemb_p, wcflat, bc_pad, wcomb.astype(f32), wq_p, bq_p, qmap_p)

    # slice the batch / Q / A padding back off
    return (preds_c[:, :B, :A], mp[:B, :A], mpc[:B, :A], qt[:B, :Q], mask[:B, :A])


# ----------------------------------------------------------------------------
# Plain-JAX glue: synthetic sub-models (opaque nn.Modules in the original code)
# ----------------------------------------------------------------------------
# TODO(synk): the real VQA sub-models / question-type backbone are arbitrary
# nn.Modules passed into MILQT.__init__; replaced here with deterministic
# linear feature extractors (glue, not the MILQT hot path).
def extract_features(visuals, boxes, questions, wf, bfeat):
    B = visuals.shape[0]
    x = jnp.concatenate(
        [visuals.reshape(B, -1), boxes.reshape(B, -1), questions.reshape(B, -1)],
        axis=1,
    )
    return jnp.tanh(jnp.einsum("bd,mdh->mbh", x, wf) + bfeat[:, None, :])   # (M, B, H)


def qt_embed(questions, wqe, bqe):
    return jax.nn.relu(questions @ wqe + bqe)   # (B, H)


# ----------------------------------------------------------------------------
# float64 numpy reference of the MILQT forward (no TPU matmul-precision ambiguity)
# ----------------------------------------------------------------------------
def milqt_reference(feats, qemb, wc, bc, wcomb, wq, bq, qmap):
    f = np.asarray(feats, np.float64)
    q = np.asarray(qemb, np.float64)
    W = np.asarray(wc, np.float64)
    b = np.asarray(bc, np.float64)
    wm = np.asarray(wcomb, np.float64)
    Wq = np.asarray(wq, np.float64)
    bqn = np.asarray(bq, np.float64)
    Qm = np.asarray(qmap, np.float64)

    qt = q @ Wq + bqn                                         # (B, Q)
    preds = np.einsum("mbh,mha->mba", f, W) + b               # (M, B, A)
    preds_c = np.einsum("mbh,mha->mba", f + q[None], W) + b   # (M, B, A)
    mp = np.einsum("mba,m->ba", preds, wm)
    mpc = np.einsum("mba,m->ba", preds_c, wm)
    qtypes = np.argmax(qt, axis=1)
    mask = Qm[qtypes]
    return preds_c, mp, mpc, qt, mask


# ----------------------------------------------------------------------------
if __name__ == "__main__":
    key = jax.random.PRNGKey(0)

    # sizes
    B = 8                    # batch
    C, HS, WS = 4, 16, 16    # visual feature map (NCHW, flattened in glue)
    NB = 4                   # boxes per image (x 4 coords)
    QD = 32                  # question feature dim
    H = 128                  # shared embedding / feature dim
    A = 128                  # number of answer classes
    Q = 8                    # number of question types
    M = 3                    # number of sub-models

    keys = jax.random.split(key, 12)
    visuals = jax.random.normal(keys[0], (B, C, HS, WS), jnp.float32)
    boxes = jax.random.normal(keys[1], (B, NB, 4), jnp.float32)
    questions = jax.random.normal(keys[2], (B, QD), jnp.float32)

    DIN = C * HS * WS + NB * 4 + QD

    # deterministic synthetic parameters
    wf = 0.05 * jax.random.normal(keys[3], (M, DIN, H), jnp.float32)
    bfeat = 0.01 * jax.random.normal(keys[4], (M, H), jnp.float32)
    wqe = 0.05 * jax.random.normal(keys[5], (QD, H), jnp.float32)
    bqe = 0.01 * jax.random.normal(keys[6], (H,), jnp.float32)
    wc = 0.05 * jax.random.normal(keys[7], (M, H, A), jnp.float32)
    bc = 0.01 * jax.random.normal(keys[8], (M, 1, A), jnp.float32)
    wq = 0.05 * jax.random.normal(keys[9], (H, Q), jnp.float32)
    bq = 0.01 * jax.random.normal(keys[10], (1, Q), jnp.float32)
    wcomb = jax.random.normal(keys[11], (M,), jnp.float32)
    qmap = (jax.random.uniform(jax.random.PRNGKey(42), (Q, A)) > 0.5).astype(jnp.float32)

    # glue: synthetic sub-model forward passes
    feats = extract_features(visuals, boxes, questions, wf, bfeat)   # (M, B, H)
    qemb = qt_embed(questions, wqe, bqe)                             # (B, H)

    outs = milqt_pallas(feats, qemb, wc, bc, wcomb, wq, bq, qmap)
    outs = jax.block_until_ready(outs)

    refs = milqt_reference(feats, qemb, wc, bc, wcomb, wq, bq, qmap)

    # bf16 MXU feeds for the classify matmuls -> loose tolerance on those outputs;
    # question_type_preds stays on an f32 path -> tighter tolerance.
    names = ["preds_combined", "model_preds", "model_preds_combined",
             "question_type_preds"]
    tols = [2e-2, 2e-2, 2e-2, 2e-3]
    for name, o, r, tol in zip(names, outs[:4], refs[:4], tols):
        o = np.asarray(o)
        assert o.shape == r.shape, name
        assert np.allclose(o, r, atol=tol, rtol=tol), f"{name} mismatch vs reference"

    # mask: only compare rows whose question-type argmax is numerically
    # unambiguous (near-tied scores may legitimately resolve differently under
    # matmul rounding -- documented tie-break drift).
    qt_ref = refs[3]
    top2 = np.sort(qt_ref, axis=1)[:, -2:]
    stable = (top2[:, 1] - top2[:, 0]) > 1e-3
    mask_out = np.asarray(outs[4])
    assert mask_out.shape == refs[4].shape
    assert np.allclose(mask_out[stable], refs[4][stable], atol=1e-5), "mask mismatch"

    print("KERNEL_OK")
</pallas_src>

<mosaic_0001>
module attributes {stable_mosaic.version = 11 : i64} {
  func.func @milqt_kernel(%arg0: i32, %arg1: memref<3x8x128xbf16, #tpu.memory_space<vmem>>, %arg2: memref<8x128xf32, #tpu.memory_space<vmem>>, %arg3: memref<128x384xbf16, #tpu.memory_space<vmem>>, %arg4: memref<3x1x128xf32, #tpu.memory_space<vmem>>, %arg5: memref<3xf32, #tpu.memory_space<smem>>, %arg6: memref<128x128xf32, #tpu.memory_space<vmem>>, %arg7: memref<1x128xf32, #tpu.memory_space<vmem>>, %arg8: memref<128x128xbf16, #tpu.memory_space<vmem>>, %arg9: memref<3x8x128xf32, #tpu.memory_space<vmem>>, %arg10: memref<8x128xf32, #tpu.memory_space<vmem>>, %arg11: memref<8x128xf32, #tpu.memory_space<vmem>>, %arg12: memref<8x128xf32, #tpu.memory_space<vmem>>, %arg13: memref<8x128xf32, #tpu.memory_space<vmem>>) attributes {dimension_semantics = [#tpu.dimension_semantics<parallel>], iteration_bounds = array<i64: 1>, scalar_prefetch = 0 : i64, scratch_operands = 0 : i64, tpu.core_type = #tpu.core_type<tc>, window_params = [{transform_indices = @transform_0, window_bounds = array<i64: 3, 8, 128>}, {transform_indices = @transform_1, window_bounds = array<i64: 8, 128>}, {pipeline_mode = #tpu.pipeline_mode<synchronous>, transform_indices = @transform_2, window_bounds = array<i64: 128, 384>}, {pipeline_mode = #tpu.pipeline_mode<synchronous>, transform_indices = @transform_3, window_bounds = array<i64: 3, 1, 128>}, {transform_indices = @transform_4, window_bounds = array<i64: 3>}, {pipeline_mode = #tpu.pipeline_mode<synchronous>, transform_indices = @transform_5, window_bounds = array<i64: 128, 128>}, {pipeline_mode = #tpu.pipeline_mode<synchronous>, transform_indices = @transform_6, window_bounds = array<i64: 1, 128>}, {pipeline_mode = #tpu.pipeline_mode<synchronous>, transform_indices = @transform_7, window_bounds = array<i64: 128, 128>}, {transform_indices = @transform_8, window_bounds = array<i64: 3, 8, 128>}, {transform_indices = @transform_9, window_bounds = array<i64: 8, 128>}, {transform_indices = @transform_10, window_bounds = array<i64: 8, 128>}, {transform_indices = @transform_11, window_bounds = array<i64: 8, 128>}, {transform_indices = @transform_12, window_bounds = array<i64: 8, 128>}]} {
    %c0 = arith.constant 0 : index
    %c0_0 = arith.constant 0 : index
    %0 = vector.load %arg2[%c0, %c0_0] : memref<8x128xf32, #tpu.memory_space<vmem>>, vector<8x128xf32>
    %1 = arith.truncf %0 : vector<8x128xf32> to vector<8x128xbf16>
    %c0_1 = arith.constant 0 : index
    %c0_2 = arith.constant 0 : index
    %2 = vector.load %arg6[%c0_1, %c0_2] : memref<128x128xf32, #tpu.memory_space<vmem>>, vector<128x128xf32>
    %cst = arith.constant dense<0.000000e+00> : vector<8x128xf32>
    %3 = tpu.matmul %0, %2, %cst {dimension_numbers = #tpu.dot_dimension_numbers<[1], [0], [0], [1], [0, 0, 1, 1], [], []>} : vector<8x128xf32>, vector<128x128xf32>, vector<8x128xf32> -> vector<8x128xf32>
    %c0_3 = arith.constant 0 : index
    %c0_4 = arith.constant 0 : index
    %4 = vector.load %arg7[%c0_3, %c0_4] : memref<1x128xf32, #tpu.memory_space<vmem>>, vector<1x128xf32>
    %5 = vector.broadcast %4 : vector<1x128xf32> to vector<8x128xf32>
    %6 = arith.addf %3, %5 : vector<8x128xf32>
    %c0_5 = arith.constant 0 : index
    %c0_6 = arith.constant 0 : index
    %7 = vector.load %arg12[%c0_5, %c0_6] : memref<8x128xf32, #tpu.memory_space<vmem>>, vector<8x128xf32>
    tpu.vector_store %arg12[%c0_5, %c0_6], %6 {strides = array<i32>} : memref<8x128xf32, #tpu.memory_space<vmem>>, vector<8x128xf32>,
    %c0_7 = arith.constant 0 : index
    %c0_8 = arith.constant 0 : index
    %8 = vector.load %arg3[%c0_7, %c0_8] : memref<128x384xbf16, #tpu.memory_space<vmem>>, vector<128x384xbf16>
    %cst_9 = arith.constant dense<0.000000e+00> : vector<8x384xf32>
    %9 = tpu.matmul %1, %8, %cst_9 {dimension_numbers = #tpu.dot_dimension_numbers<[1], [0], [0], [1], [0, 0, 1, 1], [], []>} : vector<8x128xbf16>, vector<128x384xbf16>, vector<8x384xf32> -> vector<8x384xf32>
    %cst_10 = arith.constant 0.000000e+00 : f32
    %10 = vector.broadcast %cst_10 : f32 to vector<8x128xf32>
    %cst_11 = arith.constant 0.000000e+00 : f32
    %11 = vector.broadcast %cst_11 : f32 to vector<8x128xf32>
    %c0_12 = arith.constant 0 : index
    %c0_13 = arith.constant 0 : index
    %c0_14 = arith.constant 0 : index
    %12 = vector.load %arg1[%c0_12, %c0_13, %c0_14] : memref<3x8x128xbf16, #tpu.memory_space<vmem>>, vector<1x8x128xbf16>
    %13 = vector.shape_cast %12 : vector<1x8x128xbf16> to vector<8x128xbf16>
    %c0_15 = arith.constant 0 : index
    %c0_16 = arith.constant 0 : index
    %14 = vector.load %arg3[%c0_15, %c0_16] : memref<128x384xbf16, #tpu.memory_space<vmem>>, vector<128x128xbf16>
    %c0_17 = arith.constant 0 : index
    %c0_18 = arith.constant 0 : index
    %c0_19 = arith.constant 0 : index
    %15 = vector.load %arg4[%c0_17, %c0_18, %c0_19] : memref<3x1x128xf32, #tpu.memory_space<vmem>>, vector<1x1x128xf32>
    %16 = vector.shape_cast %15 : vector<1x1x128xf32> to vector<1x128xf32>
    %cst_20 = arith.constant dense<0.000000e+00> : vector<8x128xf32>
    %17 = tpu.matmul %13, %14, %cst_20 {dimension_numbers = #tpu.dot_dimension_numbers<[1], [0], [0], [1], [0, 0, 1, 1], [], []>} : vector<8x128xbf16>, vector<128x128xbf16>, vector<8x128xf32> -> vector<8x128xf32>
    %18 = vector.broadcast %16 : vector<1x128xf32> to vector<8x128xf32>
    %19 = arith.addf %17, %18 : vector<8x128xf32>
    %20 = vector.extract_strided_slice %9 {offsets = [0, 0], sizes = [8, 128], strides = [1, 1]} : vector<8x384xf32> to vector<8x128xf32>
    %21 = arith.addf %19, %20 : vector<8x128xf32>
    %c0_21 = arith.constant 0 : index
    %c0_22 = arith.constant 0 : index
    %c0_23 = arith.constant 0 : index
    %22 = vector.load %arg9[%c0_21, %c0_22, %c0_23] : memref<3x8x128xf32, #tpu.memory_space<vmem>>, vector<1x8x128xf32>
    %23 = vector.shape_cast %22 : vector<1x8x128xf32> to vector<8x128xf32>
    %24 = vector.shape_cast %21 : vector<8x128xf32> to vector<1x8x128xf32>
    tpu.vector_store %arg9[%c0_21, %c0_22, %c0_23], %24 {strides = array<i32>} : memref<3x8x128xf32, #tpu.memory_space<vmem>>, vector<1x8x128xf32>,
    %c0_24 = arith.constant 0 : index
    %25 = memref.load %arg5[%c0_24] : memref<3xf32, #tpu.memory_space<smem>>
    %26 = vector.broadcast %25 : f32 to vector<8x128xf32>
    %27 = arith.mulf %26, %19 : vector<8x128xf32>
    %28 = arith.addf %10, %27 : vector<8x128xf32>
    %29 = vector.broadcast %25 : f32 to vector<8x128xf32>
    %30 = arith.mulf %29, %21 : vector<8x128xf32>
    %31 = arith.addf %11, %30 : vector<8x128xf32>
    %c1 = arith.constant 1 : index
    %c0_25 = arith.constant 0 : index
    %c0_26 = arith.constant 0 : index
    %32 = vector.load %arg1[%c1, %c0_25, %c0_26] : memref<3x8x128xbf16, #tpu.memory_space<vmem>>, vector<1x8x128xbf16>
    %33 = vector.shape_cast %32 : vector<1x8x128xbf16> to vector<8x128xbf16>
    %c0_27 = arith.constant 0 : index
    %c128 = arith.constant 128 : index
    %34 = vector.load %arg3[%c0_27, %c128] : memref<128x384xbf16, #tpu.memory_space<vmem>>, vector<128x128xbf16>
    %c1_28 = arith.constant 1 : index
    %c0_29 = arith.constant 0 : index
    %c0_30 = arith.constant 0 : index
    %35 = vector.load %arg4[%c1_28, %c0_29, %c0_30] : memref<3x1x128xf32, #tpu.memory_space<vmem>>, vector<1x1x128xf32>
    %36 = vector.shape_cast %35 : vector<1x1x128xf32> to vector<1x128xf32>
    %cst_31 = arith.constant dense<0.000000e+00> : vector<8x128xf32>
    %37 = tpu.matmul %33, %34, %cst_31 {dimension_numbers = #tpu.dot_dimension_numbers<[1], [0], [0], [1], [0, 0, 1, 1], [], []>} : vector<8x128xbf16>, vector<128x128xbf16>, vector<8x128xf32> -> vector<8x128xf32>
    %38 = vector.broadcast %36 : vector<1x128xf32> to vector<8x128xf32>
    %39 = arith.addf %37, %38 : vector<8x128xf32>
    %40 = vector.extract_strided_slice %9 {offsets = [0, 128], sizes = [8, 128], strides = [1, 1]} : vector<8x384xf32> to vector<8x128xf32>
    %41 = arith.addf %39, %40 : vector<8x128xf32>
    %c1_32 = arith.constant 1 : index
    %c0_33 = arith.constant 0 : index
    %c0_34 = arith.constant 0 : index
    %42 = vector.load %arg9[%c1_32, %c0_33, %c0_34] : memref<3x8x128xf32, #tpu.memory_space<vmem>>, vector<1x8x128xf32>
    %43 = vector.shape_cast %42 : vector<1x8x128xf32> to vector<8x128xf32>
    %44 = vector.shape_cast %41 : vector<8x128xf32> to vector<1x8x128xf32>
    tpu.vector_store %arg9[%c1_32, %c0_33, %c0_34], %44 {strides = array<i32>} : memref<3x8x128xf32, #tpu.memory_space<vmem>>, vector<1x8x128xf32>,
    %c1_35 = arith.constant 1 : index
    %45 = memref.load %arg5[%c1_35] : memref<3xf32, #tpu.memory_space<smem>>
    %46 = vector.broadcast %45 : f32 to vector<8x128xf32>
    %47 = arith.mulf %46, %39 : vector<8x128xf32>
    %48 = arith.addf %28, %47 : vector<8x128xf32>
    %49 = vector.broadcast %45 : f32 to vector<8x128xf32>
    %50 = arith.mulf %49, %41 : vector<8x128xf32>
    %51 = arith.addf %31, %50 : vector<8x128xf32>
    %c2 = arith.constant 2 : index
    %c0_36 = arith.constant 0 : index
    %c0_37 = arith.constant 0 : index
    %52 = vector.load %arg1[%c2, %c0_36, %c0_37] : memref<3x8x128xbf16, #tpu.memory_space<vmem>>, vector<1x8x128xbf16>
    %53 = vector.shape_cast %52 : vector<1x8x128xbf16> to vector<8x128xbf16>
    %c0_38 = arith.constant 0 : index
    %c256 = arith.constant 256 : index
    %54 = vector.load %arg3[%c0_38, %c256] : memref<128x384xbf16, #tpu.memory_space<vmem>>, vector<128x128xbf16>
    %c2_39 = arith.constant 2 : index
    %c0_40 = arith.constant 0 : index
    %c0_41 = arith.constant 0 : index
    %55 = vector.load %arg4[%c2_39, %c0_40, %c0_41] : memref<3x1x128xf32, #tpu.memory_space<vmem>>, vector<1x1x128xf32>
    %56 = vector.shape_cast %55 : vector<1x1x128xf32> to vector<1x128xf32>
    %cst_42 = arith.constant dense<0.000000e+00> : vector<8x128xf32>
    %57 = tpu.matmul %53, %54, %cst_42 {dimension_numbers = #tpu.dot_dimension_numbers<[1], [0], [0], [1], [0, 0, 1, 1], [], []>} : vector<8x128xbf16>, vector<128x128xbf16>, vector<8x128xf32> -> vector<8x128xf32>
    %58 = vector.broadcast %56 : vector<1x128xf32> to vector<8x128xf32>
    %59 = arith.addf %57, %58 : vector<8x128xf32>
    %60 = vector.extract_strided_slice %9 {offsets = [0, 256], sizes = [8, 128], strides = [1, 1]} : vector<8x384xf32> to vector<8x128xf32>
    %61 = arith.addf %59, %60 : vector<8x128xf32>
    %c2_43 = arith.constant 2 : index
    %c0_44 = arith.constant 0 : index
    %c0_45 = arith.constant 0 : index
    %62 = vector.load %arg9[%c2_43, %c0_44, %c0_45] : memref<3x8x128xf32, #tpu.memory_space<vmem>>, vector<1x8x128xf32>
    %63 = vector.shape_cast %62 : vector<1x8x128xf32> to vector<8x128xf32>
    %64 = vector.shape_cast %61 : vector<8x128xf32> to vector<1x8x128xf32>
    tpu.vector_store %arg9[%c2_43, %c0_44, %c0_45], %64 {strides = array<i32>} : memref<3x8x128xf32, #tpu.memory_space<vmem>>, vector<1x8x128xf32>,
    %c2_46 = arith.constant 2 : index
    %65 = memref.load %arg5[%c2_46] : memref<3xf32, #tpu.memory_space<smem>>
    %66 = vector.broadcast %65 : f32 to vector<8x128xf32>
    %67 = arith.mulf %66, %59 : vector<8x128xf32>
    %68 = arith.addf %48, %67 : vector<8x128xf32>
    %69 = vector.broadcast %65 : f32 to vector<8x128xf32>
    %70 = arith.mulf %69, %61 : vector<8x128xf32>
    %71 = arith.addf %51, %70 : vector<8x128xf32>
    %c0_47 = arith.constant 0 : index
    %c0_48 = arith.constant 0 : index
    %72 = vector.load %arg10[%c0_47, %c0_48] : memref<8x128xf32, #tpu.memory_space<vmem>>, vector<8x128xf32>
    tpu.vector_store %arg10[%c0_47, %c0_48], %68 {strides = array<i32>} : memref<8x128xf32, #tpu.memory_space<vmem>>, vector<8x128xf32>,
    %c0_49 = arith.constant 0 : index
    %c0_50 = arith.constant 0 : index
    %73 = vector.load %arg11[%c0_49, %c0_50] : memref<8x128xf32, #tpu.memory_space<vmem>>, vector<8x128xf32>
    tpu.vector_store %arg11[%c0_49, %c0_50], %71 {strides = array<i32>} : memref<8x128xf32, #tpu.memory_space<vmem>>, vector<8x128xf32>,
    %74 = tpu.iota {dimensions = array<i32: 1>} : vector<8x128xi32>
    %cst_51 = arith.constant dense<0xFF800000> : vector<8xf32>
    %75 = vector.multi_reduction <maximumf>, %6, %cst_51 [1] : vector<8x128xf32> to vector<8xf32>
    %76 = vector.shape_cast %75 : vector<8xf32> to vector<8x1xf32>
    %77 = vector.broadcast %76 : vector<8x1xf32> to vector<8x128xf32>
    %78 = arith.cmpf oeq, %6, %77 : vector<8x128xf32>
    %c128_i32 = arith.constant 128 : i32
    %79 = vector.broadcast %c128_i32 : i32 to vector<8x128xi32>
    %80 = arith.select %78, %74, %79 : vector<8x128xi1>, vector<8x128xi32>
    %cst_52 = arith.constant dense<2147483647> : vector<8xi32>
    %81 = vector.multi_reduction <minsi>, %80, %cst_52 [1] : vector<8x128xi32> to vector<8xi32>
    %82 = vector.shape_cast %81 : vector<8xi32> to vector<8x1xi32>
    %83 = vector.broadcast %82 : vector<8x1xi32> to vector<8x128xi32>
    %84 = arith.cmpi eq, %74, %83 : vector<8x128xi32>
    %85 = arith.extui %84 : vector<8x128xi1> to vector<8x128xi32>
    %86 = arith.sitofp %85 : vector<8x128xi32> to vector<8x128xf32>
    %87 = arith.truncf %86 : vector<8x128xf32> to vector<8x128xbf16>
    %c0_53 = arith.constant 0 : index
    %c0_54 = arith.constant 0 : index
    %88 = vector.load %arg8[%c0_53, %c0_54] : memref<128x128xbf16, #tpu.memory_space<vmem>>, vector<128x128xbf16>
    %cst_55 = arith.constant dense<0.000000e+00> : vector<8x128xf32>
    %89 = tpu.matmul %87, %88, %cst_55 {dimension_numbers = #tpu.dot_dimension_numbers<[1], [0], [0], [1], [0, 0, 1, 1], [], []>} : vector<8x128xbf16>, vector<128x128xbf16>, vector<8x128xf32> -> vector<8x128xf32>
    %c0_56 = arith.constant 0 : index
    %c0_57 = arith.constant 0 : index
    %90 = vector.load %arg13[%c0_56, %c0_57] : memref<8x128xf32, #tpu.memory_space<vmem>>, vector<8x128xf32>
    tpu.vector_store %arg13[%c0_56, %c0_57], %89 {strides = array<i32>} : memref<8x128xf32, #tpu.memory_space<vmem>>, vector<8x128xf32>,
    return
  }
  func.func @transform_0(%arg0: i32) -> (i32, i32, i32) {
    %c0_i32 = arith.constant 0 : i32
    %c0_i32_0 = arith.constant 0 : i32
    %c0_i32_1 = arith.constant 0 : i32
    return %c0_i32, %arg0, %c0_i32_0 : i32, i32, i32
  }
  func.func @transform_1(%arg0: i32) -> (i32, i32) {
    %c0_i32 = arith.constant 0 : i32
    %c0_i32_0 = arith.constant 0 : i32
    return %arg0, %c0_i32 : i32, i32
  }
  func.func @transform_2(%arg0: i32) -> (i32, i32) {
    %c0_i32 = arith.constant 0 : i32
    %c0_i32_0 = arith.constant 0 : i32
    %c0_i32_1 = arith.constant 0 : i32
    return %c0_i32, %c0_i32_0 : i32, i32
  }
  func.func @transform_3(%arg0: i32) -> (i32, i32, i32) {
    %c0_i32 = arith.constant 0 : i32
    %c0_i32_0 = arith.constant 0 : i32
    %c0_i32_1 = arith.constant 0 : i32
    %c0_i32_2 = arith.constant 0 : i32
    return %c0_i32, %c0_i32_0, %c0_i32_1 : i32, i32, i32
  }
  func.func @transform_4(%arg0: i32) -> i32 {
    %c0_i32 = arith.constant 0 : i32
    %c0_i32_0 = arith.constant 0 : i32
    return %c0_i32 : i32
  }
  func.func @transform_5(%arg0: i32) -> (i32, i32) {
    %c0_i32 = arith.constant 0 : i32
    %c0_i32_0 = arith.constant 0 : i32
    %c0_i32_1 = arith.constant 0 : i32
    return %c0_i32, %c0_i32_0 : i32, i32
  }
  func.func @transform_6(%arg0: i32) -> (i32, i32) {
    %c0_i32 = arith.constant 0 : i32
    %c0_i32_0 = arith.constant 0 : i32
    %c0_i32_1 = arith.constant 0 : i32
    return %c0_i32, %c0_i32_0 : i32, i32
  }
  func.func @transform_7(%arg0: i32) -> (i32, i32) {
    %c0_i32 = arith.constant 0 : i32
    %c0_i32_0 = arith.constant 0 : i32
    %c0_i32_1 = arith.constant 0 : i32
    return %c0_i32, %c0_i32_0 : i32, i32
  }
  func.func @transform_8(%arg0: i32) -> (i32, i32, i32) {
    %c0_i32 = arith.constant 0 : i32
    %c0_i32_0 = arith.constant 0 : i32
    %c0_i32_1 = arith.constant 0 : i32
    return %c0_i32, %arg0, %c0_i32_0 : i32, i32, i32
  }
  func.func @transform_9(%arg0: i32) -> (i32, i32) {
    %c0_i32 = arith.constant 0 : i32
    %c0_i32_0 = arith.constant 0 : i32
    return %arg0, %c0_i32 : i32, i32
  }
  func.func @transform_10(%arg0: i32) -> (i32, i32) {
    %c0_i32 = arith.constant 0 : i32
    %c0_i32_0 = arith.constant 0 : i32
    return %arg0, %c0_i32 : i32, i32
  }
  func.func @transform_11(%arg0: i32) -> (i32, i32) {
    %c0_i32 = arith.constant 0 : i32
    %c0_i32_0 = arith.constant 0 : i32
    return %arg0, %c0_i32 : i32, i32
  }
  func.func @transform_12(%arg0: i32) -> (i32, i32) {
    %c0_i32 = arith.constant 0 : i32
    %c0_i32_0 = arith.constant 0 : i32
    return %arg0, %c0_i32 : i32, i32
  }
}

</mosaic_0001>

<bundles_post_ra>
// kernel: tpu_custom_call.1
= control target key start
LH: loop header
LB: loop body
LE: loop exit
PB: predicated region body
PF: predicated region fallthrough
CT: control target
= control target key end

     0   :  { %18 = vsyncpa [#allocation3], 0  ;;  %s1829_s0 = inlined_call_operand.hbm [shape: bf16[3,8,128], index: 0, kind: input, shape index: {}]   ;;  %s1830_s1 = inlined_call_operand.hbm [shape: f32[8,128], index: 1, kind: input, shape index: {}]   ;;  %s1831_s2 = inlined_call_operand.hbm [shape: bf16[128,384], index: 2, kind: input, shape index: {}]   ;;  %s1832_s3 = inlined_call_operand.vmem [shape: f32[3,1,128], index: 3, kind: input, shape index: {}]   ;;  %s1833_s4 = inlined_call_operand.vmem [shape: f32[3], index: 4, kind: input, shape index: {}]   ;;  %s1834_s5 = inlined_call_operand.hbm [shape: f32[128,128], index: 5, kind: input, shape index: {}]   ;;  %s1835_s6 = inlined_call_operand.vmem [shape: f32[1,128], index: 6, kind: input, shape index: {}]   ;;  %s1836_s7 = inlined_call_operand.hbm [shape: bf16[128,128], index: 7, kind: input, shape index: {}]   ;;  %s1837_s8 = inlined_call_operand.hbm [shape: f32[3,8,128], index: 8, kind: output, shape index: {0}]   ;;  %s1838_s9 = inlined_call_operand.hbm [shape: f32[8,128], index: 9, kind: output, shape index: {1}]   ;;  %s1839_s10 = inlined_call_operand.hbm [shape: f32[8,128], index: 10, kind: output, shape index: {2}]   ;;  %s1840_s11 = inlined_call_operand.hbm [shape: f32[8,128], index: 11, kind: output, shape index: {3}]   ;;  %s1841_s12 = inlined_call_operand.hbm [shape: f32[8,128], index: 12, kind: output, shape index: {4}]  }
   0x1   :  { %19 = vsyncpa [#allocation7], 0 }
   0x2   :  { %20 = vsyncpa [#allocation5], 0 }
   0x3   :  { %21 = vsyncpa [#allocation11], 0 }
   0x4   :  { %22 = vsyncpa [#allocation4], 0 }
   0x5   :  { %23 = vsyncpa [#allocation15], 0 }
   0x6   :  { %24 = vsyncpa [#allocation18], 0  ;;  %s1600_s21 = smov [#allocation6]   ;;  %s1601_s23 = smov [#allocation10]  }
   0x7   :  { %s43_s22 = sshll.u32 %s1600_s21, 4  ;;  %s76_s24 = sshll.u32 %s1601_s23, 4  ;;  %s44_s22 = int_to_ptr.vmem [resolvable:$true] %s43_s22  ;;  %s77_s24 = int_to_ptr.vmem [resolvable:$true] %s76_s24 }
   0x8   :  { %s1382_s25 = scalar_lea.vmem %s44_s22, 128  ;;  %p1387_p1 = scmp.lt.s32.totalorder %s44_s22, %s44_s22 }
   0x9   :  { %p1383_p0 = scmp.ne.s32.totalorder %s44_s22, %s1382_s25  ;;  %p1388_p2 = scmp.lt.s32.totalorder %s1382_s25, %s1382_s25 }
   0xb   :  { %p1389_p3 = por %p1388_p2, %p1387_p1 }
   0xd   :  { %p1390_p4 = pnand %p1389_p3, %p1383_p0 }
   0xf   :  { %1393 = shalt.err (!%p1390_p4)
}
  0x10   :  { %46 = dma.hbm_to_vmem [thread:$0]  %s1830_s1, 128, %s44_s22, [#allocation7]  }
  0x11   :  { %s1402_s28 = scalar_lea.vmem %s77_s24, 2048  ;;  %p1407_p6 = scmp.lt.s32.totalorder %s77_s24, %s77_s24 }
  0x12   :  { %p1403_p5 = scmp.ne.s32.totalorder %s77_s24, %s1402_s28  ;;  %p1408_p7 = scmp.lt.s32.totalorder %s1402_s28, %s1402_s28 }
  0x14   :  { %p1409_p8 = por %p1408_p7, %p1407_p6 }
  0x16   :  { %p1410_p9 = pnand %p1409_p8, %p1403_p5 }
  0x18   :  { %1413 = shalt.err (!%p1410_p9)
}
  0x19   :  { %s1602_s29 = smov 128   ;;  %s1603_s30 = smov 8  }
  0x1a   :  { %82 = dma.hbm_to_vmem [thread:$0]  %s1834_s5, 2048, %s77_s24, [#allocation11], %s1602_s29, %s1602_s29, %s1603_s30  }
  0x1b   :  { %s1604_s15 = smov [#allocation2]  }
  0x1c   :  { %s30_s16 = sshll.u32 %s1604_s15, 4  ;;  %s31_s16 = int_to_ptr.vmem [resolvable:$true] %s30_s16 }
  0x1d   :  { %s1422_s1 = scalar_lea.vmem %s31_s16, 192  ;;  %p1427_p11 = scmp.lt.s32.totalorder %s31_s16, %s31_s16 }
  0x1e   :  { %p1423_p10 = scmp.ne.s32.totalorder %s31_s16, %s1422_s1  ;;  %p1428_p12 = scmp.lt.s32.totalorder %s1422_s1, %s1422_s1 }
  0x20   :  { %p1429_p13 = por %p1428_p12, %p1427_p11 }
  0x22   :  { %p1430_p0 = pnand %p1429_p13, %p1423_p10 }
  0x24   :  { %1433 = shalt.err (!%p1430_p0)
}
  0x25   :  { %s1605_s17 = smov 64   ;;  %s1606_s18 = smov 4  }
  0x26   :  { %36 = dma.hbm_to_vmem [thread:$0]  %s1829_s0, 192, %s31_s16, [#allocation3], %s1605_s17, %s1605_s17, %s1606_s18  }
  0x27   :  { %s1607_s5 = smov [#allocation8]  }
  0x28   :  { %s52_s21 = sshll.u32 %s1607_s5, 4  ;;  %s53_s21 = int_to_ptr.vmem [resolvable:$true] %s52_s21 }
  0x29   :  { %s1442_s22 = scalar_lea.vmem %s53_s21, 3072  ;;  %p1447_p2 = scmp.lt.s32.totalorder %s53_s21, %s53_s21 }
  0x2a   :  { %p1443_p1 = scmp.ne.s32.totalorder %s53_s21, %s1442_s22  ;;  %p1448_p3 = scmp.lt.s32.totalorder %s1442_s22, %s1442_s22 }
  0x2c   :  { %p1449_p4 = por %p1448_p3, %p1447_p2 }
  0x2e   :  { %p1450_p5 = pnand %p1449_p4, %p1443_p1 }
  0x30   :  { %1453 = shalt.err (!%p1450_p5)
}
  0x31   :  { %s1608_s23 = smov 192   ;;  %s1609_s24 = smov 12  }
  0x32   :  { %58 = dma.hbm_to_vmem [thread:$0]  %s1831_s2, 3072, %s53_s21, [#allocation7], %s1608_s23, %s1608_s23, %s1609_s24  }
  0x33   :  { %s67_s0 = sshll.u32 %s1833_s4, 4  ;;  %s68_s0 = int_to_ptr.vmem [resolvable:$true] %s67_s0 }
  0x34   :  { %s1454_s13 = scalar_lea.vmem %s68_s0, 16  ;;  %p1459_p7 = scmp.lt.s32.totalorder %s68_s0, %s68_s0 }
  0x35   :  { %p1455_p6 = scmp.ne.s32.totalorder %s68_s0, %s1454_s13  ;;  %p1460_p8 = scmp.lt.s32.totalorder %s1454_s13, %s1454_s13 }
  0x37   :  { %p1461_p9 = por %p1460_p8, %p1459_p7 }
  0x39   :  { %p1462_p10 = pnand %p1461_p9, %p1455_p6 }
  0x3b   :  { %1465 = shalt.err (!%p1462_p10)
}
  0x3c   :  { %s1610_s14 = smov [#allocation9]   ;;  %s1611_s15 = smov [#allocation12]  }
  0x3d   :  { %70 = dma.vmem_to_smem %s68_s0, 16, %s1610_s14, [#allocation5]  }
  0x3e   :  { %s90_s16 = sshll.u32 %s1611_s15, 4  ;;  %s91_s16 = int_to_ptr.vmem [resolvable:$true] %s90_s16 }
  0x3f   :  { %s1474_s1 = scalar_lea.vmem %s91_s16, 1024  ;;  %p1479_p12 = scmp.lt.s32.totalorder %s91_s16, %s91_s16 }
  0x40   :  { %p1475_p11 = scmp.ne.s32.totalorder %s91_s16, %s1474_s1  ;;  %p1480_p13 = scmp.lt.s32.totalorder %s1474_s1, %s1474_s1 }
  0x42   :  { %p1481_p0 = por %p1480_p13, %p1479_p12 }
  0x44   :  { %p1482_p1 = pnand %p1481_p0, %p1475_p11 }
  0x46   :  { %1485 = shalt.err (!%p1482_p1)
}
  0x47   :  { %96 = dma.hbm_to_vmem [thread:$0]  %s1836_s7, 1024, %s91_s16, [#allocation11], %s1605_s17, %s1605_s17, %s1606_s18  }
  0x48   :  { %1586 = dma.done.wait [#allocation3], 192  }
  0x49   :  { %1587 = vsyncadd [#allocation3], 4294967104 }
  0x4a   :  { %1588 = dma.done.wait [#allocation7], 3200  }
  0x4b   :  { %1589 = vsyncadd [#allocation7], 4294964096 }
  0x4c   :  { %1590 = dma.done.wait [#allocation5], 16  }
  0x4d   :  { %1591 = vsyncadd [#allocation5], 4294967280 }
  0x4e   :  { %1592 = dma.done.wait [#allocation11], 3072  }
  0x4f   :  { %1593 = vsyncadd [#allocation11], 4294964224 }
  0x50   :  { %115 = sfence }
  0x51   :  { %v134_v0 = vld [vmem:[#allocation10 + $0x78] sm:$0xff]  ;;  %v1612_v1 = vmov 0.0   ;;  %v133_v2 = vld [vmem:[#allocation10 + $0x70] sm:$0xff]  ;;  %vm1613_vm0 = vmmov 0   ;;  %v132_v3 = vld [vmem:[#allocation10 + $0x68] sm:$0xff]  ;;  %v822_v31 = vlaneseq  ;;  %v1614_v45 = vmov 0  }
  0x52   :  { %1154 = vmatprep.subr.mxu0 %v1612_v1  ;;  %1186 = vmatprep.mubr.msk.f32.mxu0 %vm1613_vm0, %v1612_v1  ;;  %v131_v4 = vld [vmem:[#allocation10 + $0x60] sm:$0xff]  ;;  %v130_v5 = vld [vmem:[#allocation10 + $0x58] sm:$0xff]  ;;  %v129_v6 = vld [vmem:[#allocation10 + $0x50] sm:$0xff]  ;;  %s1801_s5 = sld [smem:[#allocation9]]  ;;  %s1617_s26 = smov [#allocation17]  }
  0x53   :  { %1155 = vmatpush3.msra.mxu0 %v134_v0  ;;  %v128_v7 = vld [vmem:[#allocation10 + $0x48] sm:$0xff]  ;;  %v127_v8 = vld [vmem:[#allocation10 + $0x40] sm:$0xff]  ;;  %v126_v9 = vld [vmem:[#allocation10 + $0x38] sm:$0xff]  ;;  %v1737_v32 = vand.u32 127, %v822_v31  ;;  %405 = vmatprep.mubr.bf16.mxu1 %v1614_v45  ;;  %s1803_s21 = sld [smem:[#allocation9 + $0x1]]  ;;  %s989_s27 = sshll.u32 %s1617_s26, 4  ;;  %s990_s27 = int_to_ptr.vmem [resolvable:$true] %s989_s27 }
  0x54   :  { %1156 = vmatprep.subr.mxu0 %v1612_v1  ;;  %v125_v10 = vld [vmem:[#allocation10 + $0x30] sm:$0xff]  ;;  %v124_v11 = vld [vmem:[#allocation10 + $0x28] sm:$0xff]  ;;  %v123_v12 = vld [vmem:[#allocation10 + $0x20] sm:$0xff]  ;;  %s1080_s22 = sld [smem:[#allocation9 + $0x2]] }
  0x55   :  { %1157 = vmatpush3.msra.mxu0 %v133_v2  ;;  %v122_v13 = vld [vmem:[#allocation10 + $0x18] sm:$0xff]  ;;  %v121_v14 = vld [vmem:[#allocation10 + $0x10] sm:$0xff]  ;;  %v120_v15 = vld [vmem:[#allocation10 + $0x8] sm:$0xff] }
  0x56   :  { %1158 = vmatprep.subr.mxu0 %v1612_v1  ;;  %v119_v16 = vld [vmem:[#allocation10] sm:$0xff]  ;;  %v117_v17 = vld [vmem:[#allocation6] sm:$0xff]  ;;  %v1025_v18 = vld [vmem:[%s1835_s6] ss:$0 sm:$0xff] }
  0x57   :  { %1159 = vmatpush3.msra.mxu0 %v132_v3  ;;  %v1310_v22 = vld [vmem:[#allocation8 + $0xac] ss:$12 sps:$4 sm:$0xff]   ;;  %v1312_v23 = vld [vmem:[#allocation8 + $0xa8] ss:$12 sps:$4 sm:$0xff]   ;;  %v1315_v25 = vld [vmem:[#allocation8 + $0x90] ss:$12 sps:$4 sm:$0xff]   ;;  %v118_v48 = vpack.c.bf16 %v117_v17, %v117_v17 }
  0x58   :  { %1160 = vmatprep.subr.mxu0 %v1612_v1  ;;  %v1313_v24 = vld [vmem:[#allocation8 + $0x94] ss:$12 sps:$4 sm:$0xff]   ;;  %373 = vmatprep.subr.bf16.mxu1 %v1310_v22  ;;  %v1316_v26 = vld [vmem:[#allocation8 + $0x7c] ss:$12 sps:$4 sm:$0xff]   ;;  %v1318_v27 = vld [vmem:[#allocation8 + $0x78] ss:$12 sps:$4 sm:$0xff]  }
  0x59   :  { %1161 = vmatpush3.msra.mxu0 %v131_v4  ;;  %374 = vmatpush1.bf16.msra.mxu1 %v1312_v23  ;;  %v1319_v28 = vld [vmem:[#allocation8 + $0x64] ss:$12 sps:$4 sm:$0xff]   ;;  %v1321_v29 = vld [vmem:[#allocation8 + $0x60] ss:$12 sps:$4 sm:$0xff]   ;;  %v1324_v37 = vld [vmem:[#allocation8 + $0x48] ss:$12 sps:$4 sm:$0xff]  }
  0x5a   :  { %1162 = vmatprep.subr.mxu0 %v1612_v1  ;;  %375 = vmatprep.subr.bf16.mxu1 %v1313_v24  ;;  %v1322_v30 = vld [vmem:[#allocation8 + $0x4c] ss:$12 sps:$4 sm:$0xff]   ;;  %v1325_v38 = vld [vmem:[#allocation8 + $0x34] ss:$12 sps:$4 sm:$0xff]   ;;  %v1327_v39 = vld [vmem:[#allocation8 + $0x30] ss:$12 sps:$4 sm:$0xff]  }
  0x5b   :  { %1163 = vmatpush3.msra.mxu0 %v130_v5  ;;  %v1328_v40 = vld [vmem:[#allocation8 + $0x1c] ss:$12 sps:$4 sm:$0xff]   ;;  %v1330_v42 = vld [vmem:[#allocation8 + $0x18] ss:$12 sps:$4 sm:$0xff]   ;;  %v1333_v46 = vld [vmem:[#allocation8] ss:$12 sps:$4 sm:$0xff]  }
  0x5c   :  { %1164 = vmatprep.subr.mxu0 %v1612_v1  ;;  %v1334_v41 = vld [vmem:[#allocation8 + $0xb0] ss:$12 sps:$4 sm:$0xff]   ;;  %v1336_v44 = vld [vmem:[#allocation8 + $0x98] ss:$12 sps:$4 sm:$0xff]   ;;  %v1338_v47 = vld [vmem:[#allocation8 + $0x80] ss:$12 sps:$4 sm:$0xff]  }
  0x5d   :  { %1165 = vmatpush3.msra.mxu0 %v129_v6  ;;  %376 = vmatpush1.bf16.msra.mxu1 %v1315_v25  ;;  %v1331_v43 = vld [vmem:[#allocation8 + $0x4] ss:$12 sps:$4 sm:$0xff]   ;;  %v1335_v49 = vld [vmem:[#allocation8 + $0xa8] ss:$12 sps:$4 sm:$0xff]   ;;  %v1341_v55 = vld [vmem:[#allocation8 + $0x60] ss:$12 sps:$4 sm:$0xff]  }
  0x5e   :  { %1166 = vmatprep.subr.mxu0 %v1612_v1  ;;  %377 = vmatprep.subr.bf16.mxu1 %v1316_v26  ;;  %v1340_v50 = vld [vmem:[#allocation8 + $0x68] ss:$12 sps:$4 sm:$0xff]   ;;  %v1337_v51 = vld [vmem:[#allocation8 + $0x90] ss:$12 sps:$4 sm:$0xff]   ;;  %v1339_v53 = vld [vmem:[#allocation8 + $0x78] ss:$12 sps:$4 sm:$0xff]  }
  0x5f   :  { %1167 = vmatpush3.msra.mxu0 %v128_v7  ;;  %v1342_v52 = vld [vmem:[#allocation8 + $0x50] ss:$12 sps:$4 sm:$0xff]   ;;  %v1344_v54 = vld [vmem:[#allocation8 + $0x38] ss:$12 sps:$4 sm:$0xff]   ;;  %v1346_v56 = vld [vmem:[#allocation8 + $0x20] ss:$12 sps:$4 sm:$0xff]  }
  0x60   :  { %1168 = vmatprep.subr.mxu0 %v1612_v1  ;;  %v1343_v57 = vld [vmem:[#allocation8 + $0x48] ss:$12 sps:$4 sm:$0xff]   ;;  %v1345_v59 = vld [vmem:[#allocation8 + $0x30] ss:$12 sps:$4 sm:$0xff]   ;;  %v1350_v60 = vld [vmem:[#allocation8 + $0xac] ss:$12 sps:$4 sm:$0xff]  }
  0x61   :  { %1169 = vmatpush3.msra.mxu0 %v127_v8  ;;  %378 = vmatpush1.bf16.msra.mxu1 %v1318_v27  ;;  %v1348_v58 = vld [vmem:[#allocation8 + $0x8] ss:$12 sps:$4 sm:$0xff]   ;;  %v1347_v61 = vld [vmem:[#allocation8 + $0x18] ss:$12 sps:$4 sm:$0xff]   ;;  %v1349_v63 = vld [vmem:[#allocation8] ss:$12 sps:$4 sm:$0xff]  }
  0x62   :  { %1170 = vmatprep.subr.mxu0 %v1612_v1  ;;  %379 = vmatprep.subr.bf16.mxu1 %v1319_v28  ;;  %v1352_v62 = vld [vmem:[#allocation8 + $0x94] ss:$12 sps:$4 sm:$0xff]   ;;  %v1354_v0 = vld [vmem:[#allocation8 + $0x7c] ss:$12 sps:$4 sm:$0xff]   ;;  %v454_v2 = vld [vmem:[#allocation2] sm:$0xf] }
  0x63   :  { %1171 = vmatpush3.msra.mxu0 %v126_v9  ;;  %v1351_v3 = vld [vmem:[#allocation8 + $0xb0] ss:$12 sps:$4 sm:$0xff]   ;;  %v1353_v5 = vld [vmem:[#allocation8 + $0x98] ss:$12 sps:$4 sm:$0xff]   ;;  %v1355_v7 = vld [vmem:[#allocation8 + $0x80] ss:$12 sps:$4 sm:$0xff]  }
  0x64   :  { %1172 = vmatprep.subr.mxu0 %v1612_v1  ;;  %v1356_v4 = vld [vmem:[#allocation8 + $0x64] ss:$12 sps:$4 sm:$0xff]   ;;  %v1358_v6 = vld [vmem:[#allocation8 + $0x4c] ss:$12 sps:$4 sm:$0xff]   ;;  %v1360_v8 = vld [vmem:[#allocation8 + $0x34] ss:$12 sps:$4 sm:$0xff]  }
  0x65   :  { %1173 = vmatpush3.msra.mxu0 %v125_v10  ;;  %380 = vmatpush1.bf16.msra.mxu1 %v1321_v29  ;;  %v1357_v9 = vld [vmem:[#allocation8 + $0x68] ss:$12 sps:$4 sm:$0xff]   ;;  %v1370_v22 = vld [vmem:[#allocation12 + $0x18] sm:$0xff]   ;;  %v1373_v29 = vld [vmem:[#allocation12] sm:$0xff]  }
  0x66   :  { %1174 = vmatprep.subr.mxu0 %v1612_v1  ;;  %381 = vmatprep.subr.bf16.mxu1 %v1322_v30  ;;  %v1362_v10 = vld [vmem:[#allocation8 + $0x1c] ss:$12 sps:$4 sm:$0xff]   ;;  %v1371_v23 = vld [vmem:[#allocation12 + $0x10] sm:$0xff]   ;;  %v1060_v45 = vld [vmem:[%s1832_s3 + $0x1] ss:$0 sm:$0xff] }
  0x67   :  { %1175 = vmatpush3.msra.mxu0 %v124_v11  ;;  %v1359_v11 = vld [vmem:[#allocation8 + $0x50] ss:$12 sps:$4 sm:$0xff]   ;;  %v1372_v28 = vld [vmem:[#allocation12 + $0x8] sm:$0xff]  }
  0x68   :  { %1176 = vmatprep.subr.mxu0 %v1612_v1 }
  0x69   :  { %1177 = vmatpush3.msra.mxu0 %v123_v12  ;;  %382 = vmatpush1.bf16.msra.mxu1 %v1324_v37  ;;  %v1364_v12 = vld [vmem:[#allocation8 + $0x4] ss:$12 sps:$4 sm:$0xff]  }
  0x6a   :  { %1178 = vmatprep.subr.mxu0 %v1612_v1  ;;  %383 = vmatprep.subr.bf16.mxu1 %v1325_v38 }
  0x6b   :  { %1179 = vmatpush3.msra.mxu0 %v122_v13  ;;  %v1361_v13 = vld [vmem:[#allocation8 + $0x38] ss:$12 sps:$4 sm:$0xff]  }
  0x6c   :  { %1180 = vmatprep.subr.mxu0 %v1612_v1 }
  0x6d   :  { %1181 = vmatpush3.msra.mxu0 %v121_v14  ;;  %384 = vmatpush1.bf16.msra.mxu1 %v1327_v39  ;;  %v575_v14 = vld [vmem:[#allocation2 + $0x4] sm:$0xf] }
  0x6e   :  { %1182 = vmatprep.subr.mxu0 %v1612_v1  ;;  %385 = vmatprep.subr.bf16.mxu1 %v1328_v40 }
  0x6f   :  { %1183 = vmatpush3.msra.mxu0 %v120_v15  ;;  %v1366_v15 = vld [vmem:[#allocation12 + $0x38] sm:$0xff]  }
  0x70   :  { %1184 = vmatprep.subr.mxu0 %v1612_v1 }
  0x71   :  { %1185 = vmatpush3.msra.mxu0 %v119_v16  ;;  %386 = vmatpush1.bf16.msra.mxu1 %v1330_v42  ;;  %v1363_v16 = vld [vmem:[#allocation8 + $0x20] ss:$12 sps:$4 sm:$0xff]  }
  0x72   :  { %1187 = vmatmul.mubr.f32.vlgmr.msra.gmra.mxu0 %v117_v17  ;;  %1189 = vmatprep.subr.bf16.mxu0 %v1612_v1  ;;  %v1367_v17 = vld [vmem:[#allocation12 + $0x30] sm:$0xff]  }
  0x73   :  { %1205 = vmatprep.mubr.msk.bf16.mxu0 %vm1613_vm0, %v1612_v1  ;;  %1190 = vmatpush3.bf16.msra.mxu0 %v1334_v41 }
  0x74   :  { %1191 = vmatprep.subr.bf16.mxu0 %v1612_v1  ;;  %387 = vmatprep.subr.bf16.mxu1 %v1331_v43 }
  0x75   :  { %388 = vmatpush1.bf16.msra.mxu1 %v1333_v46 }
  0x76   :  { %1209 = vmatprep.subr.bf16.mxu1 %v1612_v1 }
  0x77   :  { %1192 = vmatpush3.bf16.msra.mxu0 %v1336_v44 }
  0x78   :  { %1193 = vmatprep.subr.bf16.mxu0 %v1612_v1  ;;  %406 = vmatmul.mubr.bf16.vlgmr.msra.gmra.mxu1 %v118_v48 }
  0x79   :  { %1210 = vmatpush3.bf16.msra.mxu1 %v1335_v49  ;;  %1225 = vmatprep.mubr.msk.bf16.mxu1 %vm1613_vm0, %v1612_v1 }
  0x7a   :  { %1211 = vmatprep.subr.bf16.mxu1 %v1612_v1 }
  0x7b   :  { %1194 = vmatpush3.bf16.msra.mxu0 %v1338_v47 }
  0x7c   :  { %1195 = vmatprep.subr.bf16.mxu0 %v1612_v1 }
  0x7d   :  { %1212 = vmatpush3.bf16.msra.mxu1 %v1337_v51 }
  0x7e   :  { %1213 = vmatprep.subr.bf16.mxu1 %v1612_v1 }
  0x7f   :  { %1196 = vmatpush3.bf16.msra.mxu0 %v1340_v50 }
  0x80   :  { %1197 = vmatprep.subr.bf16.mxu0 %v1612_v1 }
  0x81   :  { %1214 = vmatpush3.bf16.msra.mxu1 %v1339_v53 }
  0x82   :  { %1215 = vmatprep.subr.bf16.mxu1 %v1612_v1 }
  0x83   :  { %1198 = vmatpush3.bf16.msra.mxu0 %v1342_v52 }
  0x84   :  { %1199 = vmatprep.subr.bf16.mxu0 %v1612_v1 }
  0x85   :  { %1216 = vmatpush3.bf16.msra.mxu1 %v1341_v55 }
  0x86   :  { %1217 = vmatprep.subr.bf16.mxu1 %v1612_v1 }
  0x87   :  { %1200 = vmatpush3.bf16.msra.mxu0 %v1344_v54 }
  0x88   :  { %1201 = vmatprep.subr.bf16.mxu0 %v1612_v1 }
  0x89   :  { %1218 = vmatpush3.bf16.msra.mxu1 %v1343_v57  ;;  %v692_v57 = vstv %s1803_s21 }
  0x8a   :  { %1219 = vmatprep.subr.bf16.mxu1 %v1612_v1 }
  0x8b   :  { %1202 = vmatpush3.bf16.msra.mxu0 %v1346_v56  ;;  %v569_v56 = vstv %s1801_s5 }
  0x8c   :  { %1203 = vmatprep.subr.bf16.mxu0 %v1612_v1 }
  0x8d   :  { %1220 = vmatpush3.bf16.msra.mxu1 %v1345_v59 }
  0x8e   :  { %1221 = vmatprep.subr.bf16.mxu1 %v1612_v1 }
  0x8f   :  { %1204 = vmatpush3.bf16.msra.mxu0 %v1348_v58  ;;  %v1071_v58 = vld [vmem:[%s1832_s3 + $0x2] ss:$0 sm:$0xff] }
  0x90   :  { %1229 = vmatprep.subr.bf16.mxu0 %v1612_v1 }
  0x91   :  { %1222 = vmatpush3.bf16.msra.mxu1 %v1347_v61 }
  0x92   :  { %1206 = vmatmul.mubr.bf16.vlgmr.msra.gmra.mxu0 %v118_v48  ;;  %1223 = vmatprep.subr.bf16.mxu1 %v1612_v1 }
  0x93   :  { %1230 = vmatpush3.bf16.msra.mxu0 %v1350_v60  ;;  %1245 = vmatprep.mubr.msk.bf16.mxu0 %vm1613_vm0, %v1612_v1 }
  0x94   :  { %1231 = vmatprep.subr.bf16.mxu0 %v1612_v1 }
  0x95   :  { %1224 = vmatpush3.bf16.msra.mxu1 %v1349_v63 }
  0x96   :  { %1249 = vmatprep.subr.bf16.mxu1 %v1612_v1 }
  0x97   :  { %1232 = vmatpush3.bf16.msra.mxu0 %v1352_v62 }
  0x98   :  { %1233 = vmatprep.subr.bf16.mxu0 %v1612_v1  ;;  %1226 = vmatmul.mubr.bf16.vlgmr.msra.gmra.mxu1 %v454_v2 }
  0x99   :  { %1250 = vmatpush3.bf16.msra.mxu1 %v1351_v3  ;;  %1265 = vmatprep.mubr.msk.bf16.mxu1 %vm1613_vm0, %v1612_v1  ;;  %v1615_v3 = vmov 1.0|1.0  }
  0x9a   :  { %1251 = vmatprep.subr.bf16.mxu1 %v1612_v1 }
  0x9b   :  { %1234 = vmatpush3.bf16.msra.mxu0 %v1354_v0  ;;  %v815_v0 = vstv %s1080_s22 }
  0x9c   :  { %1235 = vmatprep.subr.bf16.mxu0 %v1612_v1 }
  0x9d   :  { %1252 = vmatpush3.bf16.msra.mxu1 %v1353_v5 }
  0x9e   :  { %1253 = vmatprep.subr.bf16.mxu1 %v1612_v1 }
  0x9f   :  { %1236 = vmatpush3.bf16.msra.mxu0 %v1356_v4 }
  0xa0   :  { %1237 = vmatprep.subr.bf16.mxu0 %v1612_v1 }
  0xa1   :  { %1254 = vmatpush3.bf16.msra.mxu1 %v1355_v7 }
  0xa2   :  { %1255 = vmatprep.subr.bf16.mxu1 %v1612_v1 }
  0xa3   :  { %1238 = vmatpush3.bf16.msra.mxu0 %v1358_v6 }
  0xa4   :  { %1239 = vmatprep.subr.bf16.mxu0 %v1612_v1 }
  0xa5   :  { %1256 = vmatpush3.bf16.msra.mxu1 %v1357_v9 }
  0xa6   :  { %1257 = vmatprep.subr.bf16.mxu1 %v1612_v1 }
  0xa7   :  { %1240 = vmatpush3.bf16.msra.mxu0 %v1360_v8 }
  0xa8   :  { %1241 = vmatprep.subr.bf16.mxu0 %v1612_v1 }
  0xa9   :  { %1258 = vmatpush3.bf16.msra.mxu1 %v1359_v11 }
  0xaa   :  { %1259 = vmatprep.subr.bf16.mxu1 %v1612_v1 }
  0xab   :  { %1242 = vmatpush3.bf16.msra.mxu0 %v1362_v10 }
  0xac   :  { %1243 = vmatprep.subr.bf16.mxu0 %v1612_v1 }
  0xad   :  { %1260 = vmatpush3.bf16.msra.mxu1 %v1361_v13 }
  0xae   :  { %1261 = vmatprep.subr.bf16.mxu1 %v1612_v1 }
  0xaf   :  { %1244 = vmatpush3.bf16.msra.mxu0 %v1364_v12 }
  0xb0   :  { %1269 = vmatprep.subr.bf16.mxu0 %v1612_v1 }
  0xb1   :  { %1262 = vmatpush3.bf16.msra.mxu1 %v1363_v16 }
  0xb2   :  { %1246 = vmatmul.mubr.bf16.vlgmr.msra.gmra.mxu0 %v575_v14  ;;  %1263 = vmatprep.subr.bf16.mxu1 %v1612_v1 }
  0xb3   :  { %1270 = vmatpush3.bf16.msra.mxu0 %v1366_v15  ;;  %1285 = vmatprep.mubr.msk.bf16.mxu0 %vm1613_vm0, %v1612_v1 }
  0xb4   :  { %1271 = vmatprep.subr.bf16.mxu0 %v1612_v1 }
  0xb7   :  { %1272 = vmatpush3.bf16.msra.mxu0 %v1367_v17 }
  0xb8   :  { %1273 = vmatprep.subr.bf16.mxu0 %v1612_v1 }
 0x132   :  { %v208_v19 = vpop.f32.mrf.mxu0 }
 0x133   :  { %v209_v20 = vadd.f32 %v1025_v18, %v208_v19  ;;  %v1365_v18 = vld [vmem:[#allocation8 + $0x8] ss:$12 sps:$4 sm:$0xff]  }
 0x134   :  { %v1188_v21 = vpop.f32.mrf.mxu0  ;;  %v1368_v19 = vld [vmem:[#allocation12 + $0x28] sm:$0xff]   ;;  %1264 = vmatpush3.bf16.msra.mxu1 %v1365_v18 }
 0x135   :  { %212 = vst [vmem:[#allocation17] sm:$0xff] %v209_v20  ;;  %824 = vmax.xlane.f32.xlu0 %v209_v20  ;;  %1274 = vmatpush3.bf16.msra.mxu0 %v1368_v19  ;;  %v1369_v21 = vld [vmem:[#allocation12 + $0x20] sm:$0xff]  }
 0x136   :  { %1275 = vmatprep.subr.bf16.mxu0 %v1612_v1 }
 0x138   :  { %v407_v30 = vpop.f32.mrf.mxu1 }
 0x139   :  { %1276 = vmatpush3.bf16.msra.mxu0 %v1369_v21 }
 0x13a   :  { %1277 = vmatprep.subr.bf16.mxu0 %v1612_v1  ;;  %v409_v31 = vpop.f32.mrf.mxu1 }
 0x13d   :  { %1278 = vmatpush3.bf16.msra.mxu0 %v1370_v22 }
 0x13e   :  { %1279 = vmatprep.subr.bf16.mxu0 %v1612_v1 }
 0x141   :  { %1280 = vmatpush3.bf16.msra.mxu0 %v1371_v23 }
 0x142   :  { %1281 = vmatprep.subr.bf16.mxu0 %v1612_v1 }
 0x145   :  { %1282 = vmatpush3.bf16.msra.mxu0 %v1372_v28 }
 0x146   :  { %1283 = vmatprep.subr.bf16.mxu0 %v1612_v1 }
 0x149   :  { %1284 = vmatpush3.bf16.msra.mxu0 %v1373_v29 }
 0x152   :  { %v448_v37 = vpop.f32.mrf.mxu0 }
 0x154   :  { %v1207_v38 = vpop.f32.mrf.mxu0 }
 0x156   :  { %v451_v39 = vpop.f32.mrf.mxu0 }
 0x1be   :  { %v825_v33 = vpop.xlane.xlu0 %824 }
 0x1bf   :  { %vm826_vm1 = vcmp.eq.f32.partialorder %v209_v20, %v825_v33  ;;  %v698_v20 = vld [vmem:[#allocation2 + $0x8] sm:$0xf]  ;;  %v411_v33 = vpop.f32.mrf.mxu1 }
 0x1c0   :  { %v1740_v34 = vsel %vm826_vm1, %v1737_v32, 128  ;;  %1266 = vmatmul.mubr.bf16.vlgmr.msra.gmra.mxu1 %v698_v20 }
 0x1c1   :  { %v829_v35 = vshra.s32 %v1740_v34, 16  ;;  %v828_v24 = vand.u32 65535, %v1740_v34  ;;  %v1208_v34 = vpop.f32.mrf.mxu0 }
 0x1c3   :  { %v1743_v36 = vcvt.s32.f32 %v829_v35  ;;  %v830_v26 = vcvt.s32.f32 %v828_v24  ;;  %v412_v35 = vpop.f32.mrf.mxu1  ;;  %v682_v46 = vpop.f32.mrf.mxu0 }
 0x1c4   :  { %v683_v47 = vadd.f32 %v1060_v45, %v682_v46 }
 0x1c5   :  { %832 = vmin.xlane.f32.xlu0 %v1743_v36  ;;  %v560_v40 = vpop.f32.mrf.mxu1  ;;  %v1247_v48 = vpop.f32.mrf.mxu0 }
 0x1c6   :  { %v688_v49 = vadd.f32 %v683_v47, %v409_v31  ;;  %v693_v11 = vmul.f32 %v692_v57, %v683_v47 }
 0x1c7   :  { %v1227_v42 = vpop.f32.mrf.mxu1  ;;  %v685_v51 = vpop.f32.mrf.mxu0 }
 0x1c8   :  { %690 = vst [vmem:[#allocation13 + $0x8] sm:$0xff] %v688_v49  ;;  %v695_v62 = vmul.f32 %v692_v57, %v688_v49 }
 0x1c9   :  { %v563_v44 = vpop.f32.mrf.mxu1  ;;  %v1248_v52 = vpop.f32.mrf.mxu0 }
 0x1cb   :  { %v1228_v1 = vpop.f32.mrf.mxu1 }
 0x24e   :  { %v833_v25 = vpop.xlane.xlu0 %832 }
 0x24f   :  { %vm834_vm2 = vcmp.eq.f32.partialorder %v1743_v36, %v833_v25  ;;  %v1050_v36 = vld [vmem:[%s1832_s3] ss:$0 sm:$0xff]  ;;  %v839_v50 = vcvt.f32.s32 %v833_v25  ;;  %s1616_s3 = smov [#allocation14]  }
 0x250   :  { %v835_v27 = vsel %vm834_vm2, %v830_v26, inf  ;;  %v561_v41 = vadd.f32 %v1050_v36, %v560_v40  ;;  %s969_s25 = sshll.u32 %s1616_s3, 4  ;;  %s970_s25 = int_to_ptr.vmem [resolvable:$true] %s969_s25 }
 0x251   :  { %836 = vmin.xlane.f32.xlu1 %v835_v27  ;;  %v840_v54 = vshll.u32 %v839_v50, 16  ;;  %s1486_s28 = scalar_lea.vmem %s970_s25, 128  ;;  %p1491_p3 = scmp.lt.s32.totalorder %s970_s25, %s970_s25 }
 0x252   :  { %v566_v43 = vadd.f32 %v561_v41, %v407_v30  ;;  %v570_v10 = vmul.f32 %v569_v56, %v561_v41  ;;  %p1487_p2 = scmp.ne.s32.totalorder %s970_s25, %s1486_s28  ;;  %p1492_p4 = scmp.lt.s32.totalorder %s1486_s28, %s1486_s28 }
 0x254   :  { %567 = vst [vmem:[#allocation13] sm:$0xff] %v566_v43  ;;  %v572_v61 = vmul.f32 %v569_v56, %v566_v43  ;;  %p1493_p5 = por %p1492_p4, %p1491_p3 }
 0x256   :  { %v696_v6 = vadd.f32 %v695_v62, %v572_v61  ;;  %p1494_p6 = pnand %p1493_p5, %p1487_p2 }
 0x280   :  { %v805_v60 = vpop.f32.mrf.mxu1 }
 0x281   :  { %v806_v63 = vadd.f32 %v1071_v58, %v805_v60 }
 0x282   :  { %v1267_v2 = vpop.f32.mrf.mxu1 }
 0x283   :  { %v811_v4 = vadd.f32 %v806_v63, %v448_v37  ;;  %v816_v12 = vmul.f32 %v815_v0, %v806_v63 }
 0x284   :  { %v808_v5 = vpop.f32.mrf.mxu1 }
 0x285   :  { %813 = vst [vmem:[#allocation13 + $0x10] sm:$0xff] %v811_v4  ;;  %v818_v7 = vmul.f32 %v815_v0, %v811_v4 }
 0x286   :  { %v1268_v8 = vpop.f32.mrf.mxu1 }
 0x287   :  { %v819_v9 = vadd.f32 %v818_v7, %v696_v6 }
 0x289   :  { %821 = vst [vmem:[#allocation16] sm:$0xff] %v819_v9 }
 0x2da   :  { %v837_v53 = vpop.xlane.xlu1 %836 }
 0x2db   :  { %v838_v55 = vcvt.f32.s32 %v837_v53 }
 0x2dd   :  { %v841_v59 = vadd.s32 %v840_v54, %v838_v55 }
 0x2df   :  { %vm842_vm3 = vcmp.eq.s32.totalorder %v1737_v32, %v841_v59  ;;  %v694_v32 = vadd.f32 %v693_v11, %v570_v10 }
 0x2e0   :  { %vm1090_vm4 = vmpackc.low %vm842_vm3, %vm842_vm3 }
 0x2e1   :  { %1286 = vmatmul.mubr.msk.bf16.vlgmr.msra.gmra.mxu0 %vm1090_vm4, %v1615_v3  ;;  %v817_v13 = vadd.f32 %v816_v12, %v694_v32 }
 0x2e3   :  { %820 = vst [vmem:[#allocation14] sm:$0xff] %v817_v13 }
 0x2e4   :  { %1497 = shalt.err (!%p1494_p6)
}
 0x2e5   :  { %972 = dma.vmem_to_hbm [thread:$0]  %s970_s25, 128, %s1838_s9, [#allocation15]  }
 0x2e6   :  { %s1506_s14 = scalar_lea.vmem %s990_s27, 128  ;;  %p1511_p8 = scmp.lt.s32.totalorder %s990_s27, %s990_s27 }
 0x2e7   :  { %p1507_p7 = scmp.ne.s32.totalorder %s990_s27, %s1506_s14  ;;  %p1512_p9 = scmp.lt.s32.totalorder %s1506_s14, %s1506_s14 }
 0x2e9   :  { %p1513_p10 = por %p1512_p9, %p1511_p8 }
 0x2eb   :  { %p1514_p11 = pnand %p1513_p10, %p1507_p7 }
 0x2ed   :  { %1517 = shalt.err (!%p1514_p11)
}
 0x2ee   :  { %992 = dma.vmem_to_hbm [thread:$0]  %s990_s27, 128, %s1840_s11, [#allocation18]  }
 0x2ef   :  { %s1618_s1 = smov [#allocation13]   ;;  %s1619_s4 = smov [#allocation16]  }
 0x2f0   :  { %s956_s2 = sshll.u32 %s1618_s1, 4  ;;  %s979_s7 = sshll.u32 %s1619_s4, 4  ;;  %s957_s2 = int_to_ptr.vmem [resolvable:$true] %s956_s2  ;;  %s980_s7 = int_to_ptr.vmem [resolvable:$true] %s979_s7 }
 0x2f1   :  { %s1526_s17 = scalar_lea.vmem %s957_s2, 384  ;;  %p1531_p13 = scmp.lt.s32.totalorder %s957_s2, %s957_s2 }
 0x2f2   :  { %p1527_p12 = scmp.ne.s32.totalorder %s957_s2, %s1526_s17  ;;  %p1532_p0 = scmp.lt.s32.totalorder %s1526_s17, %s1526_s17 }
 0x2f4   :  { %p1533_p1 = por %p1532_p0, %p1531_p13 }
 0x2f6   :  { %p1534_p2 = pnand %p1533_p1, %p1527_p12 }
 0x2f8   :  { %1537 = shalt.err (!%p1534_p2)
}
 0x2f9   :  { %962 = dma.vmem_to_hbm [thread:$0]  %s957_s2, 384, %s1837_s8, [#allocation4], %s1602_s29, %s1602_s29, %s1603_s30  }
 0x2fa   :  { %s1546_s11 = scalar_lea.vmem %s980_s7, 128  ;;  %p1551_p4 = scmp.lt.s32.totalorder %s980_s7, %s980_s7 }
 0x2fb   :  { %p1547_p3 = scmp.ne.s32.totalorder %s980_s7, %s1546_s11  ;;  %p1552_p5 = scmp.lt.s32.totalorder %s1546_s11, %s1546_s11 }
 0x2fd   :  { %p1553_p6 = por %p1552_p5, %p1551_p4 }
 0x2ff   :  { %p1554_p7 = pnand %p1553_p6, %p1547_p3 }
 0x301   :  { %1557 = shalt.err (!%p1554_p7)
}
 0x302   :  { %982 = dma.vmem_to_hbm [thread:$0]  %s980_s7, 128, %s1839_s10, [#allocation15]  }
 0x303   :  { %s1620_s20 = smov [#allocation19]  }
 0x304   :  { %s999_s5 = sshll.u32 %s1620_s20, 4  ;;  %s1000_s5 = int_to_ptr.vmem [resolvable:$true] %s999_s5 }
 0x305   :  { %s1566_s21 = scalar_lea.vmem %s1000_s5, 128  ;;  %p1571_p9 = scmp.lt.s32.totalorder %s1000_s5, %s1000_s5 }
 0x306   :  { %p1567_p8 = scmp.ne.s32.totalorder %s1000_s5, %s1566_s21  ;;  %p1572_p10 = scmp.lt.s32.totalorder %s1566_s21, %s1566_s21 }
 0x308   :  { %p1573_p11 = por %p1572_p10, %p1571_p9 }
 0x30a   :  { %p1574_p12 = pnand %p1573_p11, %p1567_p8 }
 0x3a1   :  { %v944_v14 = vpop.f32.mrf.mxu0 }
 0x3a2   :  { %950 = vst [vmem:[#allocation19] sm:$0xff] %v944_v14 }
 0x3a3   :  { %v1287_v15 = vpop.f32.mrf.mxu0 }
 0x3a4   :  { %1577 = shalt.err (!%p1574_p12)
}
 0x3a5   :  { %1002 = dma.vmem_to_hbm [thread:$0]  %s1000_s5, 128, %s1841_s12, [#allocation18]   ;;  %v947_v16 = vpop.f32.mrf.mxu0 }
 0x3a7   :  { %v1288_v17 = vpop.f32.mrf.mxu0 }
 0x3a8   :  { %1594 = dma.done.wait [#allocation4], 384  }
 0x3a9   :  { %1595 = vsyncadd [#allocation4], 4294966912 }
 0x3aa   :  { %1596 = dma.done.wait [#allocation15], 256  }
 0x3ab   :  { %1597 = vsyncadd [#allocation15], 4294967040 }
 0x3ac   :  { %1598 = dma.done.wait [#allocation18], 256  }
 0x3ad   :  { %1599 = vsyncadd [#allocation18], 4294967040 }
 0x3ae   :  { %1018 = vsyncpa [#allocation3], 1 }
 0x3af   :  { %1019 = vsyncpa [#allocation7], 1 }
 0x3b0   :  { %1020 = vsyncpa [#allocation11], 1 }
 0x3b1   :  { %1021 = vsyncpa [#allocation4], 1 }
 0x3b2   :  { %1022 = vsyncpa [#allocation15], 1 }
 0x3b3   :  { %1023 = vsyncpa [#allocation18], 1 }
 0x3b4   :  { %1024 = vsyncpa [#allocation5], 1 }

</bundles_post_ra>
